<compile_context>
chip_gen: v5e
topology: v5e:2x2
jax: 0.10.0
libtpu: 0.0.40
codegen_flags: <defaults>
</compile_context>

<pallas_src>
import jax
import jax.numpy as jnp
from jax import lax
from jax.experimental import pallas as pl
from jax.experimental.pallas import tpu as pltpu


def _round_up(x, m):
    return (x + m - 1) // m * m


def _gather_kernel(ids_ref, emb_hbm_ref, out_ref, buf_ref, copy_sem):
    """ids_ref:     SMEM int32 [t_pad]   flattened (clamped) token ids
       emb_hbm_ref: ANY/HBM    [V, D]    full embedding table (never tiled)
       out_ref:     VMEM       [tb, D]   output tile for this token block
       buf_ref:     VMEM       [tb, D]   DMA staging buffer
       copy_sem:    DMA semaphore shared by all row copies of this block"""
    tb = out_ref.shape[0]
    base = pl.program_id(0) * tb

    # Fan out one row DMA per token in the tile; they all overlap in flight.
    def _start(t, carry):
        row = ids_ref[base + t]
        pltpu.make_async_copy(
            emb_hbm_ref.at[pl.ds(row, 1)],   # [1, D] table row in HBM
            buf_ref.at[pl.ds(t, 1)],         # [1, D] staging row in VMEM
            copy_sem,
        ).start()
        return carry

    lax.fori_loop(0, tb, _start, 0)

    # All copies signal the same semaphore with the same size (one [1, D]
    # row), so waiting tb times with a row-sized descriptor drains them all.
    def _wait(t, carry):
        pltpu.make_async_copy(
            emb_hbm_ref.at[pl.ds(0, 1)],
            buf_ref.at[pl.ds(0, 1)],
            copy_sem,
        ).wait()
        return carry

    lax.fori_loop(0, tb, _wait, 0)

    # Single lane-dense store into the pipelined output block.
    out_ref[...] = buf_ref[...]


def skipgram_embedding(x, emb_table, *, tb=256):
    """x: int [B, S]; emb_table: float32 [V, D] -> float32 [B, S, D]."""
    B, S = x.shape
    V, D = emb_table.shape
    num_tokens = B * S

    # Token tile: large by default (amortize ~0.35 us/grid-step overhead),
    # shrunk for small inputs so there are >= ~4 blocks on the "parallel"
    # axis (v7x megacore) while staying sublane-aligned (multiple of 8).
    tokens8 = _round_up(num_tokens, 8)
    tb_eff = min(tb, max(8, _round_up(-(-tokens8 // 4), 8)))
    t_pad = _round_up(num_tokens, tb_eff)

    # Clamp ids (torch would raise on OOB) so the DMA gather never reads out
    # of bounds.  Padded slots gather row 0 and are sliced off below.
    flat_idx = jnp.clip(x.reshape(num_tokens).astype(jnp.int32), 0, V - 1)
    idx_p = jnp.pad(flat_idx, (0, t_pad - num_tokens))

    itemsize = jnp.dtype(emb_table.dtype).itemsize
    block_bytes = tb_eff * D * itemsize
    # staging buffer + double-buffered output block + slack; clamp so the
    # same config is safe on v7x (64 MiB physical VMEM).
    vmem_limit = min(48 * 1024 * 1024,
                     max(8 * 1024 * 1024, 4 * block_bytes + (1 << 20)))

    out_flat = pl.pallas_call(
        _gather_kernel,
        out_shape=jax.ShapeDtypeStruct((t_pad, D), emb_table.dtype),
        grid_spec=pltpu.PrefetchScalarGridSpec(
            num_scalar_prefetch=1,
            grid=(t_pad // tb_eff,),
            in_specs=[pl.BlockSpec(memory_space=pl.ANY)],   # table stays in HBM
            out_specs=pl.BlockSpec((tb_eff, D), lambda i, ids: (i, 0)),
            scratch_shapes=[
                pltpu.VMEM((tb_eff, D), emb_table.dtype),
                pltpu.SemaphoreType.DMA,
            ],
        ),
        compiler_params=pltpu.CompilerParams(
            dimension_semantics=("parallel",),
            vmem_limit_bytes=vmem_limit,
        ),
    )(idx_p, emb_table)

    return out_flat[:num_tokens].reshape(B, S, D)


if __name__ == "__main__":
    # Small, deterministic setup consistent with SkipGramModel(v_size, emb_dim)
    v_size, emb_dim = 64, 128
    batch, seq = 2, 8

    key = jax.random.PRNGKey(0)
    k_emb, k_idx = jax.random.split(key)

    # nn.Embedding default init: N(0, 1)
    emb_table = jax.random.normal(k_emb, (v_size, emb_dim), dtype=jnp.float32)
    x = jax.random.randint(k_idx, (batch, seq), 0, v_size, dtype=jnp.int32)

    out = skipgram_embedding(x, emb_table)
    out = jax.block_until_ready(out)

    # Reference check against plain JAX gather (same semantics as nn.Embedding)
    ref = emb_table[x]
    assert out.shape == (batch, seq, emb_dim)
    assert jnp.allclose(out, ref), "mismatch vs reference embedding lookup"

    print("KERNEL_OK")
</pallas_src>

<mosaic_0001>
module attributes {stable_mosaic.version = 11 : i64} {
  func.func @_gather_kernel(%arg0: i32, %arg1: memref<16xi32, #tpu.memory_space<smem>>, %arg2: memref<64x128xf32, #tpu.memory_space<any>>, %arg3: memref<8x128xf32, #tpu.memory_space<vmem>>, %arg4: memref<8x128xf32, #tpu.memory_space<vmem>>, %arg5: memref<!tpu.dma_semaphore, #tpu.memory_space<semaphore_mem>>) attributes {dimension_semantics = [#tpu.dimension_semantics<parallel>], iteration_bounds = array<i64: 2>, scalar_prefetch = 1 : i64, scratch_operands = 2 : i64, tpu.core_type = #tpu.core_type<tc>, window_params = [{}, {transform_indices = @transform_1, window_bounds = array<i64: 8, 128>}]} {
    %c8_i32 = arith.constant 8 : i32
    %0 = arith.muli %arg0, %c8_i32 : i32
    %c0_i32 = arith.constant 0 : i32
    %c8_i32_0 = arith.constant 8 : i32
    %1 = arith.addi %c0_i32, %c8_i32_0 : i32
    %c1_i32 = arith.constant 1 : i32
    scf.for %arg6 = %c0_i32 to %1 step %c1_i32  : i32 {
      %5 = arith.addi %0, %arg6 : i32
      %6 = arith.index_cast %5 : i32 to index
      %7 = memref.load %arg1[%6] : memref<16xi32, #tpu.memory_space<smem>>
      %c0_i32_8 = arith.constant 0 : i32
      %8 = tpu.memref_slice %arg2[%7, %c0_i32_8] : memref<64x128xf32, #tpu.memory_space<any>> -> memref<1x128xf32, #tpu.memory_space<any>>
      %c0_i32_9 = arith.constant 0 : i32
      %9 = tpu.memref_slice %arg4[%arg6, %c0_i32_9] : memref<8x128xf32, #tpu.memory_space<vmem>> -> memref<1x128xf32, #tpu.memory_space<vmem>>
      tpu.enqueue_dma source(%8 : memref<1x128xf32, #tpu.memory_space<any>>) target(%9 : memref<1x128xf32, #tpu.memory_space<vmem>>) target_semaphore(%arg5 : memref<!tpu.dma_semaphore, #tpu.memory_space<semaphore_mem>>)
    }
    %c8_i32_1 = arith.constant 8 : i32
    %c0_i32_2 = arith.constant 0 : i32
    %c8_i32_3 = arith.constant 8 : i32
    %2 = arith.addi %c0_i32_2, %c8_i32_3 : i32
    %c1_i32_4 = arith.constant 1 : i32
    scf.for %arg6 = %c0_i32_2 to %2 step %c1_i32_4  : i32 {
      %c0_i32_8 = arith.constant 0 : i32
      %c0_i32_9 = arith.constant 0 : i32
      %5 = tpu.memref_slice %arg2[%c0_i32_8, %c0_i32_9] : memref<64x128xf32, #tpu.memory_space<any>> -> memref<1x128xf32, #tpu.memory_space<any>>
      %c0_i32_10 = arith.constant 0 : i32
      %c0_i32_11 = arith.constant 0 : i32
      %6 = tpu.memref_slice %arg4[%c0_i32_10, %c0_i32_11] : memref<8x128xf32, #tpu.memory_space<vmem>> -> memref<1x128xf32, #tpu.memory_space<vmem>>
      tpu.wait_dma2 semaphore(%arg5 : memref<!tpu.dma_semaphore, #tpu.memory_space<semaphore_mem>>) src(%5 : memref<1x128xf32, #tpu.memory_space<any>>) dst(%6 : memref<1x128xf32, #tpu.memory_space<vmem>>)
    }
    %c0 = arith.constant 0 : index
    %c0_5 = arith.constant 0 : index
    %3 = vector.load %arg4[%c0, %c0_5] : memref<8x128xf32, #tpu.memory_space<vmem>>, vector<8x128xf32>
    %c0_6 = arith.constant 0 : index
    %c0_7 = arith.constant 0 : index
    %4 = vector.load %arg3[%c0_6, %c0_7] : memref<8x128xf32, #tpu.memory_space<vmem>>, vector<8x128xf32>
    tpu.vector_store %arg3[%c0_6, %c0_7], %3 {strides = array<i32>} : memref<8x128xf32, #tpu.memory_space<vmem>>, vector<8x128xf32>,
    return
  }
  func.func @transform_1(%arg0: i32, %arg1: memref<16xi32, #tpu.memory_space<smem>>) -> (i32, i32) {
    %c0_i32 = arith.constant 0 : i32
    %c0_i32_0 = arith.constant 0 : i32
    return %arg0, %c0_i32 : i32, i32
  }
}

</mosaic_0001>

<bundles_post_ra>
// kernel: tpu_custom_call.1
= control target key start
LH: loop header
LB: loop body
LE: loop exit
PB: predicated region body
PF: predicated region fallthrough
CT: control target
= control target key end

     0   :  { %s338_s12 = smov [#allocation5]   ;;  %s458_s0 = inlined_call_operand.hbm [shape: s32[16], index: 0, kind: input, shape index: {}]   ;;  %s459_s1 = inlined_call_operand.hbm [shape: f32[64,128], index: 1, kind: input, shape index: {}]   ;;  %s460_s2 = inlined_call_operand.hbm [shape: f32[16,128], index: 2, kind: output, shape index: {}]  }
   0x1   :  { %s8_s11 = sshll.u32 %s458_s0, 4  ;;  %s9_s11 = int_to_ptr.hbm [resolvable:$true] %s8_s11 }
   0x2   :  { %11 = dma.hbm_to_smem %s9_s11, 16, %s338_s12, [#allocation4] }
   0x3   :  { %310 = dma.done.wait [#allocation4], 16 }
   0x4   :  { %311 = vsyncadd [#allocation4], 4294967280 }
   0x5   :  { %14 = sfence }
   0x6   :  { %15 = vsyncpa [#allocation7], 0 }
   0x7   :  { %17 = vsyncpa [#allocation7 + $0x1], 0  ;;  %s358_s13 = smov 0   ;;  %s360_s14 = smov 0  }
   0x8   :  { %s362_s15 = smov 0  }
   0x9 LB: > { %s168_s0 = sadd.s32 4294967295, %s328_s15   ;;  %s375_s16 = sadd.s32 1, %s328_s15   ;;  %s328_s15 = sphi %s362_s15, %s465_s15   ;;  %s324_s14 = sphi %s360_s14, %s464_s14   ;;  %s320_s13 = sphi %s358_s13, %s463_s13  }
   0xa   : > { %s26_s17 = ssub.s32 %s328_s15, %s375_s16  ;;  %s29_s18 = sadd.s32 1, %s324_s14 }
   0xb   : > { %p27_p0 = scmp.eq.s32.totalorder %s26_s17, 0  ;;  %p169_p1 = scmp.ne.s32.totalorder %s26_s17, 0 }
   0xc   : > { %p33_p2 = scmp.eq.s32.totalorder %s328_s15, 1  ;;  %p38_p3 = scmp.ne.s32.totalorder %s324_s14, %s320_s13 }
   0xd   : > { %s384_s19 = scalar_select %p27_p0, %s324_s14, %s29_s18  }
   0xe   : > { %p386_p4 = por %p169_p1, %p33_p2  ;;  %p39_p5 = scmp.eq.s32.totalorder %s168_s0, 1 }
   0xf   : > { %p170_p7 = scmp.ge.s32.totalorder %s328_s15, 2 }
  0x10   : > { %p390_p6 = por %p39_p5, %p38_p3  ;;  %s53_s22 = sand.u32 (!%p170_p7), 1, %s324_s14  }
  0x11   : > { %48 = sbr.rel (%p170_p7) target bundleno = 76 (0x4c), region = 12  ;;  %s172_s23 = sshll.u32 (!%p170_p7), %s328_s15, 3 }
  0x12   : > { %s399_s24 = sshll.u32 (!%p170_p7), %s53_s22, 3  ;;  %s402_s26 = smov (!%p170_p7), 0  }
  0x13   : > { %s55_s25 = scalar_lea.vmem (!%p170_p7), [#allocation6], %s399_s24 }
  0x16 LB: >> { %s63_s27 = sadd.s32 %s332_s26, %s172_s23  ;;  %s66_s29 = scalar_lea.vmem [#allocation2], %s332_s26  ;;  %s332_s26 = sphi %s402_s26, %s62_s26  }
  0x17   : >> { %s64_s28 = sld [smem:[#allocation5 + %s63_s27]]  ;;  %s76_s30 = sshll.u32 %s66_s29, 4  ;;  %s77_s30 = int_to_ptr.vmem [resolvable:$true] %s76_s30 }
  0x18   : >> { %s242_s11 = scalar_lea.hbm %s459_s1, 64 }
  0x1d   : >> { %s65_s5 = scalar_lea.hbm %s459_s1, %s64_s28 }
  0x1e   : >> { %s74_s6 = sshll.u32 %s65_s5, 4  ;;  %s75_s6 = int_to_ptr.hbm [resolvable:$true] %s74_s6 }
  0x1f   : >> { %s238_s7 = sshra.s32 %s75_s6, 4  ;;  %s239_s7 = int_to_ptr.hbm [resolvable:$true] %s238_s7 }
  0x20   : >> { %s240_s8 = scalar_lea.hbm %s239_s7, 1  ;;  %p243_p9 = scmp.lt.s32.totalorder %s239_s7, %s459_s1 }
  0x21   : >> { %p241_p8 = scmp.ne.s32.totalorder %s239_s7, %s240_s8  ;;  %p244_p10 = scmp.lt.s32.totalorder %s242_s11, %s240_s8 }
  0x23   : >> { %p245_p11 = por %p244_p10, %p243_p9 }
  0x25   : >> { %p246_p12 = pnand %p245_p11, %p241_p8 }
  0x27   : >> { %249 = shalt.err (!%p246_p12)  }
  0x28   : >> { %s250_s17 = sshra.s32 %s77_s30, 4  ;;  %s339_s27 = smov [#allocation2]   ;;  %s251_s17 = int_to_ptr.vmem [resolvable:$true] %s250_s17 }
  0x29   : >> { %s252_s18 = scalar_lea.vmem %s251_s17, 1  ;;  %s254_s28 = scalar_lea.vmem %s339_s27, 8 }
  0x2a   : >> { %p253_p13 = scmp.ne.s32.totalorder %s251_s17, %s252_s18  ;;  %p255_p0 = scmp.lt.s32.totalorder %s251_s17, [#allocation2] }
  0x2b   : >> { %p256_p1 = scmp.lt.s32.totalorder %s254_s28, %s252_s18 }
  0x2d   : >> { %p257_p2 = por %p256_p1, %p255_p0 }
  0x2f   : >> { %p258_p3 = pnand %p257_p2, %p253_p13 }
  0x31   : >> { %261 = shalt.err (!%p258_p3)  }
  0x32   : >> { %79 = dma.hbm_to_vmem [thread:$0]  %s75_s6, 16, %s77_s30, [#allocation3] }
  0x33   : >> { %s62_s26 = sadd.s32 1, %s332_s26  }
  0x34   : >> { %p59_p5 = scmp.ge.s32.totalorder %s62_s26, 8  }
  0x35   : > { %s334_s29 = smov (%p59_p5), 0  }
  0x36   : > { %61 = sbr.rel (!%p59_p5) target bundleno = 22 (0x16), region = 64 }
  0x3b LB: >> { %312 = dma.done.wait [#allocation3], 16  ;;  %s336_s29 = sphi %s334_s29, %s85_s29  }
  0x3c   : >> { %313 = vsyncadd [#allocation3], 4294967280  ;;  %s85_s29 = sadd.s32 1, %s336_s29  }
  0x3d   : >> { %p82_p7 = scmp.ge.s32.totalorder %s85_s29, 8  }
  0x3e   : > { %v89_v0 = vld [vmem:[#allocation2] sm:$0xff] (%p82_p7)  ;;  %s102_s26 = scalar_lea.hbm (%p82_p7), %s460_s2, %s172_s23  ;;  %s104_s4 = sshll.u32 (%p82_p7), %s55_s25, 4  ;;  %s105_s4 = int_to_ptr.vmem [resolvable:$true] %s104_s4 }
  0x3f   : > { %84 = sbr.rel (!%p82_p7) target bundleno = 59 (0x3b), region = 75  ;;  %90 = vst [vmem:[%s55_s25] sm:$0xff] (%p82_p7), %v89_v0  ;;  %s106_s5 = sshll.u32 (%p82_p7), %s102_s26, 4  ;;  %s107_s5 = int_to_ptr.hbm [resolvable:$true] %s106_s5 }
  0x40   : > { %s92_s6 = scalar_lea.sflag (%p82_p7), [#allocation7], %s53_s22  ;;  %s276_s7 = sshra.s32 (%p82_p7), %s107_s5, 4  ;;  %s277_s7 = int_to_ptr.hbm [resolvable:$true] %s276_s7 }
  0x41   : > { %s278_s8 = scalar_lea.hbm (%p82_p7), %s277_s7, 8  ;;  %s282_s23 = scalar_lea.hbm (%p82_p7), %s460_s2, 16 }
  0x42   : > { %p279_p8 = scmp.ne.s32.totalorder (%p82_p7), %s277_s7, %s278_s8  ;;  %p283_p11 = scmp.lt.s32.totalorder (%p82_p7), %s277_s7, %s460_s2 }
  0x43   : > { %p284_p12 = scmp.lt.s32.totalorder (%p82_p7), %s282_s23, %s278_s8 }
  0x44   : > { %p280_p9 = pnand %p279_p8, %p386_p4 }
  0x45   : > { %p285_p13 = por %p284_p12, %p283_p11 }
  0x46   : > { %p281_p10 = pneg %p280_p9 }
  0x48   : > { %p286_p0 = pnand %p285_p13, %p281_p10 }
  0x4a   : > { %289 = shalt.err (!%p286_p0)
}
  0x4b   : > { %178 = dma.vmem_to_hbm [thread:$0]  (%p386_p4), %s105_s4, 128, %s107_s5, %s92_s6  }
  0x4c PF: > { %p184_p1 = scmp.ge.s32.totalorder %s328_s15, 1  ;;  %s118_s22 = sand.u32 1, %s320_s13  }
  0x4d   : > { %s119_s24 = scalar_lea.sflag [#allocation7], %s118_s22 }
  0x4e   : > { %p181_p2 = pnand %p184_p1, %p390_p6 }
  0x50   : > { %p182_p3 = pneg %p181_p2 }
  0x52   : > { %315 = dma.done.wait (%p182_p3), %s119_s24, 128  }
  0x53   : > { %317 = vsyncadd (%p182_p3), %s119_s24, 4294967168  ;;  %p20_p5 = scmp.ge.s32.totalorder %s375_s16, 3   ;;  %s463_s13 = smov %s324_s14 }
  0x54   : > { %s464_s14 = smov %s384_s19  ;;  %s465_s15 = smov %s375_s16 }
  0x55   :  { %22 = sbr.rel (!%p20_p5) target bundleno = 9 (0x9), region = 86 }
  0x5a   :  { %125 = vsyncpa [#allocation7], 1 }
  0x5b   :  { %127 = vsyncpa [#allocation7 + $0x1], 1 }
  0x5c   :  { %128 = vsyncmov [#allocation3] }
  0x5f   :  { %s129_s15 = vpop.sfrf %128 }
  0x60   :  { %p177_p4 = scmp.ne.s32.totalorder %s129_s15, 0 }
  0x62   :  { %133 = shalt.err (%p177_p4)  }

</bundles_post_ra>
